<compile_context>
chip_gen: v7x
topology: tpu7x:2x2x1
jax: 0.10.0
libtpu: 0.0.40
codegen_flags: <defaults>
</compile_context>

<pallas_src>
import functools
import math

import jax
import jax.numpy as jnp
import numpy as np
from jax.experimental import pallas as pl
from jax.experimental.pallas import tpu as pltpu

LANES = 128
SUBLANES = 8
MAX_TILE_ROWS = 2048   # 2048x128 f32 tile = 1 MiB; x2 double-buffered = 2 MiB VMEM


def _cdiv(a, b):
    return -(-a // b)


def _round_up(a, m):
    return _cdiv(a, m) * m


def _fused_norm_kernel(tile_off_ref, ntiles_ref, x_ref, o_ref, acc_ref, *, p):
    """Fused p-norms of many weight segments packed in one (rows, 128) slab.

    grid = (num_weights, max_tiles).  For weight w, tiles t in [0, ntiles[w])
    hold its zero-padded elements; sum |x|^p accumulates into a fixed (8, 128)
    f32 scratch and is finalized with ^(1/p) on the segment's last tile.
    """
    t = pl.program_id(1)
    nt = ntiles_ref[pl.program_id(0)]

    @pl.when(t == 0)                     # new weight segment -> reset accumulator
    def _():
        acc_ref[...] = jnp.zeros_like(acc_ref)

    @pl.when(t < nt)                     # real tile (skip clamped trailing steps)
    def _():
        x = x_ref[...].astype(jnp.float32)   # stream native dtype, cast per tile
        if p == 2.0:
            xp = x * x
        elif p == 1.0:
            xp = jnp.abs(x)
        else:
            xp = jnp.abs(x) ** p
        # Row-group reduction: (R,128) -> (R/8,8,128), sum over axis 0 is pure
        # vreg-wise VPU adds; the running sum stays in a single vreg-sized acc.
        acc_ref[...] += xp.reshape(-1, SUBLANES, LANES).sum(axis=0)

    @pl.when(t == nt - 1)                # finalize this weight's norm
    def _():
        total = jnp.sum(acc_ref[...])    # one small cross-lane reduce per weight
        if p == 2.0:
            norm = jnp.sqrt(total)       # EUP op, free VLIW slot
        elif p == 1.0:
            norm = total
        else:
            norm = total ** (1.0 / p)
        o_ref[...] = jnp.full((1, SUBLANES, LANES), norm, dtype=jnp.float32)


@functools.partial(jax.jit, static_argnames=("p", "max_tile_rows"))
def fused_regularization_loss(weights, weight_decay, *, p=2.0,
                              max_tile_rows=MAX_TILE_ROWS):
    """weight_decay * sum_w (sum |w|^p)^(1/p), one fused Pallas reduction."""
    p = float(p)
    if p <= 0:
        raise ValueError("p must be > 0 (zero padding is only valid for p > 0)")
    num_w = len(weights)

    # Common streaming dtype: bf16 weights stay bf16 (halves HBM traffic);
    # the f32 upcast happens per tile inside the kernel.
    common = functools.reduce(jnp.promote_types, [w.dtype for w in weights])
    if not jnp.issubdtype(common, jnp.floating):
        common = jnp.float32

    # Row tile: as large as useful (>=85% of HBM roofline beyond ~512 rows) but
    # no larger than the biggest weight needs, so tiny weights don't drag in
    # huge zero-padded tiles.  Always a multiple of 8 (sublane granularity).
    max_elems = max(int(math.prod(w.shape)) for w in weights)
    tile_rows = min(_round_up(int(max_tile_rows), SUBLANES),
                    _round_up(_cdiv(max_elems, LANES), SUBLANES))
    chunk = tile_rows * LANES

    # Pack all weights into one lane-dense (total_rows, 128) slab.  Each weight
    # is zero-padded to a whole number of tiles so segment boundaries are
    # tile-aligned (zeros contribute nothing to sum |x|^p for p > 0).  XLA
    # fuses the pads + concat into a single slab-assembly pass — the price of
    # turning N tiny kernel launches into one streaming pass.
    segs = []
    tile_off = np.zeros((num_w,), np.int32)   # first tile index of each weight
    ntiles = np.zeros((num_w,), np.int32)     # tile count of each weight
    off = 0
    for i, warr in enumerate(weights):
        flat = jnp.ravel(warr).astype(common)
        n = flat.shape[0]
        nt = max(1, _cdiv(n, chunk))
        pad = nt * chunk - n
        if pad:
            flat = jnp.pad(flat, (0, pad))
        segs.append(flat.reshape(nt * tile_rows, LANES))
        tile_off[i] = off
        ntiles[i] = nt
        off += nt
    slab = segs[0] if num_w == 1 else jnp.concatenate(segs, axis=0)
    max_tiles = int(ntiles.max())

    def x_index_map(wi, ti, off_ref, nt_ref):
        # Clamp past-the-end tile indices to the segment's last tile: the block
        # index stops changing (no extra DMA), and the kernel skips the
        # accumulation via pl.when(t < ntiles[w]).
        return off_ref[wi] + jnp.minimum(ti, nt_ref[wi] - 1), 0

    def o_index_map(wi, ti, off_ref, nt_ref):
        return wi, 0, 0

    grid_spec = pltpu.PrefetchScalarGridSpec(
        num_scalar_prefetch=2,
        grid=(num_w, max_tiles),
        in_specs=[pl.BlockSpec((tile_rows, LANES), x_index_map)],
        out_specs=pl.BlockSpec((1, SUBLANES, LANES), o_index_map),
        scratch_shapes=[pltpu.VMEM((SUBLANES, LANES), jnp.float32)],
    )

    norms = pl.pallas_call(
        functools.partial(_fused_norm_kernel, p=p),
        out_shape=jax.ShapeDtypeStruct((num_w, SUBLANES, LANES), jnp.float32),
        grid_spec=grid_spec,
        compiler_params=pltpu.CompilerParams(
            # Weight axis parallel -> both TensorCores on v7x (no-op on
            # single-TC v5e/v6e); the tile/reduction axis must stay sequential.
            dimension_semantics=("parallel", "arbitrary")),
    )(jnp.asarray(tile_off), jnp.asarray(ntiles), slab)

    # One tiny fused op over num_weights scalars (stays in JAX so the weight
    # grid axis can remain "parallel"; the ^(1/p) already ran in-kernel).
    return (weight_decay * jnp.sum(norms[:, 0, 0])).astype(jnp.float32)


class Regularization:
    """JAX/Pallas port of the PyTorch Regularization module.

    `model_params` is a dict {param_name: array} standing in for
    model.named_parameters().
    """

    def __init__(self, model_params, weight_decay, p=2):
        if weight_decay < 0:
            raise ValueError("param weight_decay can not <0")
        self.weight_decay = float(weight_decay)
        self.p = float(p)
        self.weight_list = self.get_weight(model_params)

    @staticmethod
    def get_weight(model_params):
        weight_list = []
        for name, param in model_params.items():
            if "dec" in name and "weight" in name:
                weight_list.append((name, param))
        return weight_list

    def __call__(self, model_params):
        self.weight_list = self.get_weight(model_params)
        return self.regularization_loss(self.weight_list, self.weight_decay,
                                        self.p)

    @staticmethod
    def regularization_loss(weight_list, weight_decay, p):
        if not weight_list:
            return jnp.float32(0.0)
        weights = tuple(w for _, w in weight_list)
        return fused_regularization_loss(weights, jnp.float32(weight_decay),
                                         p=float(p))

    @staticmethod
    def weight_info(weight_list):
        print("---------------regularization weight---------------")
        for name, _ in weight_list:
            print(name)


if __name__ == "__main__":
    key = jax.random.PRNGKey(0)
    k1, k2, k3, k4, k5, k6 = jax.random.split(key, 6)

    # Synthetic "model" parameters (PyTorch-style names & layouts).
    # Only the 'dec*weight' entries are regularized, matching get_weight().
    model_params = {
        "encoder.enc_conv.weight": jax.random.normal(k1, (8, 4, 3), jnp.float32),
        "encoder.enc_dense.weight": jax.random.normal(k2, (16, 32), jnp.float32),
        "decoder.dec_dense1.weight": jax.random.normal(k3, (64, 300), jnp.float32),
        "decoder.dec_dense1.bias": jnp.zeros((64,), jnp.float32),
        "decoder.dec_conv1.weight": jax.random.normal(k4, (4, 8, 3, 3), jnp.float32),
        "decoder.dec_conv2.weight": jax.random.normal(k5, (2, 4, 5), jnp.float32),
        "decoder.dec_dense2.weight": jax.random.normal(k6, (32, 8), jnp.float32),
    }

    weight_decay = 0.1
    reg_weights = [w for n, w in model_params.items()
                   if "dec" in n and "weight" in n]

    # p = 2 (default), single fused kernel launch for all 4 decoder weights.
    reg = Regularization(model_params, weight_decay=weight_decay, p=2)
    loss = jax.block_until_ready(reg(model_params))
    ref_l2 = weight_decay * sum(jnp.linalg.norm(jnp.ravel(w)) for w in reg_weights)
    assert jnp.allclose(loss, ref_l2, rtol=1e-4, atol=1e-5), (loss, ref_l2)

    # p = 1 path.
    reg_l1 = Regularization(model_params, weight_decay=weight_decay, p=1)
    loss_l1 = jax.block_until_ready(reg_l1(model_params))
    ref_l1 = weight_decay * sum(jnp.sum(jnp.abs(w)) for w in reg_weights)
    assert jnp.allclose(loss_l1, ref_l1, rtol=1e-4, atol=1e-4), (loss_l1, ref_l1)

    # Multi-tile path: force several tiles for the large weight plus clamped /
    # skipped trailing steps for the small ones; must agree with the reference.
    loss_small_tiles = jax.block_until_ready(
        fused_regularization_loss(tuple(reg_weights), jnp.float32(weight_decay),
                                  p=2.0, max_tile_rows=8))
    assert jnp.allclose(loss_small_tiles, ref_l2, rtol=1e-4, atol=1e-5), (
        loss_small_tiles, ref_l2)

    print("KERNEL_OK")
</pallas_src>

<mosaic_0001>
module attributes {stable_mosaic.version = 11 : i64} {
  func.func @_fused_norm_kernel(%arg0: i32, %arg1: i32, %arg2: memref<4xi32, #tpu.memory_space<smem>>, %arg3: memref<4xi32, #tpu.memory_space<smem>>, %arg4: memref<152x128xf32, #tpu.memory_space<vmem>>, %arg5: memref<1x8x128xf32, #tpu.memory_space<vmem>>, %arg6: memref<8x128xf32, #tpu.memory_space<vmem>>) attributes {dimension_semantics = [#tpu.dimension_semantics<parallel>, #tpu.dimension_semantics<arbitrary>], iteration_bounds = array<i64: 4, 1>, scalar_prefetch = 2 : i64, scratch_operands = 1 : i64, tpu.core_type = #tpu.core_type<tc>, window_params = [{transform_indices = @transform_0, window_bounds = array<i64: 152, 128>}, {transform_indices = @transform_1, window_bounds = array<i64: 1, 8, 128>}]} {
    %0 = arith.index_cast %arg0 : i32 to index
    %1 = memref.load %arg3[%0] : memref<4xi32, #tpu.memory_space<smem>>
    %c0_i32 = arith.constant 0 : i32
    %2 = arith.cmpi eq, %arg1, %c0_i32 : i32
    %3 = arith.extui %2 : i1 to i32
    %c0_i32_0 = arith.constant 0 : i32
    %4 = arith.cmpi ne, %3, %c0_i32_0 : i32
    scf.if %4 {
      %cst = arith.constant 0.000000e+00 : f32
      %12 = vector.broadcast %cst : f32 to vector<8x128xf32>
      %c0 = arith.constant 0 : index
      %c0_3 = arith.constant 0 : index
      %13 = vector.load %arg6[%c0, %c0_3] : memref<8x128xf32, #tpu.memory_space<vmem>>, vector<8x128xf32>
      tpu.vector_store %arg6[%c0, %c0_3], %12 {strides = array<i32>} : memref<8x128xf32, #tpu.memory_space<vmem>>, vector<8x128xf32>,
    } else {
    }
    %5 = arith.cmpi slt, %arg1, %1 : i32
    %6 = arith.extui %5 : i1 to i32
    %c0_i32_1 = arith.constant 0 : i32
    %7 = arith.cmpi ne, %6, %c0_i32_1 : i32
    scf.if %7 {
      %c0 = arith.constant 0 : index
      %c0_3 = arith.constant 0 : index
      %12 = vector.load %arg4[%c0, %c0_3] : memref<152x128xf32, #tpu.memory_space<vmem>>, vector<152x128xf32>
      %13 = arith.mulf %12, %12 : vector<152x128xf32>
      %c0_4 = arith.constant 0 : index
      %c0_5 = arith.constant 0 : index
      %14 = vector.load %arg6[%c0_4, %c0_5] : memref<8x128xf32, #tpu.memory_space<vmem>>, vector<8x128xf32>
      %15 = vector.shape_cast %13 : vector<152x128xf32> to vector<19x8x128xf32>
      %cst = arith.constant dense<0.000000e+00> : vector<8x128xf32>
      %16 = vector.multi_reduction <add>, %15, %cst [0] : vector<19x8x128xf32> to vector<8x128xf32>
      %17 = arith.addf %14, %16 : vector<8x128xf32>
      %c0_6 = arith.constant 0 : index
      %c0_7 = arith.constant 0 : index
      %18 = vector.load %arg6[%c0_6, %c0_7] : memref<8x128xf32, #tpu.memory_space<vmem>>, vector<8x128xf32>
      tpu.vector_store %arg6[%c0_6, %c0_7], %17 {strides = array<i32>} : memref<8x128xf32, #tpu.memory_space<vmem>>, vector<8x128xf32>,
    } else {
    }
    %c1_i32 = arith.constant 1 : i32
    %8 = arith.subi %1, %c1_i32 : i32
    %9 = arith.cmpi eq, %arg1, %8 : i32
    %10 = arith.extui %9 : i1 to i32
    %c0_i32_2 = arith.constant 0 : i32
    %11 = arith.cmpi ne, %10, %c0_i32_2 : i32
    scf.if %11 {
      %c0 = arith.constant 0 : index
      %c0_3 = arith.constant 0 : index
      %12 = vector.load %arg6[%c0, %c0_3] : memref<8x128xf32, #tpu.memory_space<vmem>>, vector<8x128xf32>
      %13 = vector.shape_cast %12 : vector<8x128xf32> to vector<1x8x128xf32>
      %cst = arith.constant dense<0.000000e+00> : vector<1xf32>
      %14 = vector.multi_reduction <add>, %13, %cst [1, 2] : vector<1x8x128xf32> to vector<1xf32>
      %15 = vector.shape_cast %14 : vector<1xf32> to vector<1x1x1xf32>
      %16 = vector.extract %15[0, 0, 0] : f32 from vector<1x1x1xf32>
      %17 = math.sqrt %16 : f32
      %18 = vector.broadcast %17 : f32 to vector<1x8x128xf32>
      %c0_4 = arith.constant 0 : index
      %c0_5 = arith.constant 0 : index
      %c0_6 = arith.constant 0 : index
      %19 = vector.load %arg5[%c0_4, %c0_5, %c0_6] : memref<1x8x128xf32, #tpu.memory_space<vmem>>, vector<1x8x128xf32>
      tpu.vector_store %arg5[%c0_4, %c0_5, %c0_6], %18 {strides = array<i32>} : memref<1x8x128xf32, #tpu.memory_space<vmem>>, vector<1x8x128xf32>,
    } else {
    }
    return
  }
  func.func @transform_0(%arg0: i32, %arg1: i32, %arg2: memref<4xi32, #tpu.memory_space<smem>>, %arg3: memref<4xi32, #tpu.memory_space<smem>>) -> (i32, i32) {
    %0 = arith.index_cast %arg0 : i32 to index
    %1 = memref.load %arg2[%0] : memref<4xi32, #tpu.memory_space<smem>>
    %2 = arith.index_cast %arg0 : i32 to index
    %3 = memref.load %arg3[%2] : memref<4xi32, #tpu.memory_space<smem>>
    %c1_i32 = arith.constant 1 : i32
    %4 = arith.subi %3, %c1_i32 : i32
    %5 = arith.minsi %arg1, %4 : i32
    %6 = arith.addi %1, %5 : i32
    %c0_i32 = arith.constant 0 : i32
    %c0_i32_0 = arith.constant 0 : i32
    return %6, %c0_i32 : i32, i32
  }
  func.func @transform_1(%arg0: i32, %arg1: i32, %arg2: memref<4xi32, #tpu.memory_space<smem>>, %arg3: memref<4xi32, #tpu.memory_space<smem>>) -> (i32, i32, i32) {
    %c0_i32 = arith.constant 0 : i32
    %c0_i32_0 = arith.constant 0 : i32
    %c0_i32_1 = arith.constant 0 : i32
    return %arg0, %c0_i32, %c0_i32_0 : i32, i32, i32
  }
}

</mosaic_0001>

<bundles_post_ra>
// kernel: fused_regularization_loss.1
= control target key start
LH: loop header
LB: loop body
LE: loop exit
PB: predicated region body
PF: predicated region fallthrough
CT: control target
= control target key end

     0   :  { %s532_s0 = inlined_call_operand.vmem [shape: s32[4], index: 0, kind: input, shape index: {}]   ;;  %s533_s2 = inlined_call_operand.vmem [shape: f32[608,128], index: 2, kind: input, shape index: {}]   ;;  %s534_s3 = inlined_call_operand.vmem [shape: f32[4,8,128], index: 3, kind: output, shape index: {}]   ;;  %s535_s1 = inlined_call_operand.vmem [shape: s32[4], index: 1, kind: input, shape index: {}]  }
   0x1   :  { %s8_s14 = sshll.u32 %s532_s0, 4  ;;  %s12_s17 = sshll.u32 %s535_s1, 4  ;;  %s9_s14 = int_to_ptr.vmem [resolvable:$true] %s8_s14  ;;  %s13_s17 = int_to_ptr.vmem [resolvable:$true] %s12_s17 }
   0x2   :  { %s392_s18 = scalar_lea.vmem %s9_s14, 16  ;;  %p397_p1 = scmp.lt.s32.totalorder %s9_s14, %s9_s14 }
   0x3   :  { %p393_p0 = scmp.ne.s32.totalorder %s9_s14, %s392_s18  ;;  %p398_p2 = scmp.lt.s32.totalorder %s392_s18, %s392_s18 }
   0x5   :  { %p399_p3 = por %p398_p2, %p397_p1 }
   0x7   :  { %p400_p4 = pnand %p399_p3, %p393_p0 }
   0x9   :  { %403 = shalt.err (!%p400_p4)  }
   0xa   :  { %s442_s19 = smov [#allocation4]   ;;  %s404_s20 = scalar_lea.vmem %s13_s17, 16 }
   0xb   :  { %11 = dma.vmem_to_smem %s9_s14, 16, %s442_s19, [#allocation3] }
   0xc   :  { %p405_p5 = scmp.ne.s32.totalorder %s13_s17, %s404_s20  ;;  %p409_p6 = scmp.lt.s32.totalorder %s13_s17, %s13_s17 }
   0xd   :  { %p410_p7 = scmp.lt.s32.totalorder %s404_s20, %s404_s20 }
   0xf   :  { %p411_p8 = por %p410_p7, %p409_p6 }
  0x11   :  { %p412_p9 = pnand %p411_p8, %p405_p5 }
  0x13   :  { %415 = shalt.err (!%p412_p9)  }
  0x14   :  { %s443_s0 = smov [#allocation5]  }
  0x15   :  { %15 = dma.vmem_to_smem %s13_s17, 16, %s443_s0, [#allocation3] }
  0x16   :  { %428 = dma.done.wait [#allocation3], 32 }
  0x17   :  { %429 = vsyncadd [#allocation3], 4294967264 }
  0x18   :  { %17 = sfence }
  0x19   :  { %s471_s1 = smov 0   ;;  %s473_s21 = smov 0  }
  0x1a   :  { %s475_s22 = smov 0  }
  0x1b LB: > { %s35_s23 = sadd.s32 1, %s436_s21  ;;  %p347_p10 = scmp.ge.s32.totalorder %s440_s22, 1  ;;  %s440_s22 = sphi %s475_s22, %s23_s22   ;;  %s436_s21 = sphi %s473_s21, %s537_s21   ;;  %s432_s1 = sphi %s471_s1, %s536_s1  }
  0x1c   : > { %p37_p11 = scmp.ge.s32.totalorder %s35_s23, 4  ;;  %p136_p12 = scmp.lt.s32.totalorder %s440_s22, 5 }
  0x1e   : > { %s539_s23 = smov (%p37_p11, %s35_s23), 0  ;;  %p137_p13 = pnand %p347_p10, %p136_p12 }
  0x1f   : > { %s162_s24 = sld [smem:[#allocation5 + %s432_s1]] (!%p137_p13)  ;;  %p179_p0 = scmp.lt.s32.totalorder (!%p137_p13), %s432_s1, 3  ;;  %v444_v0 = vmov (!%p137_p13), 0.0  }
  0x20   : > { %140 = sbr.rel (%p137_p13) target bundleno = 370 (0x172), region = 24  ;;  %s489_s25 = sld [smem:[#allocation5 + %s432_s1]] (!%p137_p13)  ;;  %188 = vst [vmem:[#allocation2] sm:$0xff] (!%p137_p13), %v444_v0 }
  0x21   : > { %s161_s26 = sld [smem:[#allocation4 + %s432_s1]] (!%p137_p13) }
  0x25   : > { %s348_s28 = sadd.s32 (!%p137_p13), 4294967295, %s162_s24 }
  0x26   : > { %p349_p1 = scmp.gt.s32.totalorder (!%p137_p13), %s348_s28, 0  ;;  %p353_p3 = scmp.le.s32.totalorder (!%p137_p13), %s489_s25, 0 }
  0x27   : > { %s541_s1 = smov (!%p179_p0, %s432_s1), 3  ;;  %v231_v56 = vld [vmem:[#allocation2] sm:$0xff] (!%p353_p3) }
  0x28   : > { %s351_s27 = sshll.u32 %s541_s1, 3  ;;  %s543_s28 = smov (%p349_p1, %s348_s28), 0 }
  0x29   : > { %s494_s4 = scalar_lea.vmem %s534_s3, %s351_s27  ;;  %s166_s5 = sadd.s32 %s543_s28, %s161_s26 }
  0x2a   : > { %s167_s6 = smul.u32 19, %s166_s5 }
  0x2b   : > { %192 = sbr.rel (%p353_p3) target bundleno = 91 (0x5b), region = 32 }
  0x2c   : > { %p168_p2 = scmp.lt.s32.totalorder %s167_s6, 75 }
  0x2e   : > { %s545_s6 = smov (!%p168_p2, %s167_s6), 75 }
  0x2f   : > { %s350_s7 = sshll.u32 %s545_s6, 3 }
  0x30   : > { %s499_s10 = scalar_lea.vmem %s533_s2, %s350_s7 }
  0x31   : > { %v193_v1 = vld [vmem:[%s499_s10] sm:$0xff] (!%p353_p3)  ;;  %v194_v2 = vld [vmem:[%s499_s10 + $0x8] sm:$0xff] (!%p353_p3)  ;;  %v195_v3 = vld [vmem:[%s499_s10 + $0x10] sm:$0xff] (!%p353_p3) }
  0x32   : > { %v196_v4 = vld [vmem:[%s499_s10 + $0x18] sm:$0xff]  ;;  %v212_v5 = vmul.f32 %v193_v1, %v193_v1  ;;  %v213_v6 = vmul.f32 %v194_v2, %v194_v2  ;;  %v214_v7 = vmul.f32 %v195_v3, %v195_v3  ;;  %v197_v8 = vld [vmem:[%s499_s10 + $0x20] sm:$0xff]  ;;  %v198_v11 = vld [vmem:[%s499_s10 + $0x28] sm:$0xff] }
  0x33   : > { %v215_v9 = vmul.f32 %v196_v4, %v196_v4  ;;  %v216_v12 = vmul.f32 %v197_v8, %v197_v8  ;;  %v199_v14 = vld [vmem:[%s499_s10 + $0x30] sm:$0xff]  ;;  %v217_v15 = vmul.f32 %v198_v11, %v198_v11  ;;  %v200_v17 = vld [vmem:[%s499_s10 + $0x38] sm:$0xff]  ;;  %v201_v20 = vld [vmem:[%s499_s10 + $0x40] sm:$0xff] }
  0x34   : > { %v232_v10 = vadd.f32 %v213_v6, %v212_v5  ;;  %v218_v18 = vmul.f32 %v199_v14, %v199_v14  ;;  %v219_v21 = vmul.f32 %v200_v17, %v200_v17  ;;  %v202_v23 = vld [vmem:[%s499_s10 + $0x48] sm:$0xff]  ;;  %v220_v24 = vmul.f32 %v201_v20, %v201_v20  ;;  %v203_v26 = vld [vmem:[%s499_s10 + $0x50] sm:$0xff]  ;;  %v204_v29 = vld [vmem:[%s499_s10 + $0x58] sm:$0xff] }
  0x35   : > { %v221_v27 = vmul.f32 %v202_v23, %v202_v23  ;;  %v222_v30 = vmul.f32 %v203_v26, %v203_v26  ;;  %v205_v32 = vld [vmem:[%s499_s10 + $0x60] sm:$0xff]  ;;  %v223_v33 = vmul.f32 %v204_v29, %v204_v29  ;;  %v206_v35 = vld [vmem:[%s499_s10 + $0x68] sm:$0xff]  ;;  %v207_v38 = vld [vmem:[%s499_s10 + $0x70] sm:$0xff] }
  0x36   : > { %v233_v13 = vadd.f32 %v232_v10, %v214_v7  ;;  %v224_v36 = vmul.f32 %v205_v32, %v205_v32  ;;  %v225_v39 = vmul.f32 %v206_v35, %v206_v35  ;;  %v208_v41 = vld [vmem:[%s499_s10 + $0x78] sm:$0xff]  ;;  %v226_v42 = vmul.f32 %v207_v38, %v207_v38  ;;  %v209_v44 = vld [vmem:[%s499_s10 + $0x80] sm:$0xff]  ;;  %v210_v47 = vld [vmem:[%s499_s10 + $0x88] sm:$0xff] }
  0x37   : > { %v227_v45 = vmul.f32 %v208_v41, %v208_v41  ;;  %v228_v48 = vmul.f32 %v209_v44, %v209_v44  ;;  %v211_v50 = vld [vmem:[%s499_s10 + $0x90] sm:$0xff]  ;;  %v229_v51 = vmul.f32 %v210_v47, %v210_v47 }
  0x38   : > { %v234_v16 = vadd.f32 %v233_v13, %v215_v9  ;;  %v230_v53 = vmul.f32 %v211_v50, %v211_v50 }
  0x3a   : > { %v235_v19 = vadd.f32 %v234_v16, %v216_v12 }
  0x3c   : > { %v236_v22 = vadd.f32 %v235_v19, %v217_v15 }
  0x3e   : > { %v237_v25 = vadd.f32 %v236_v22, %v218_v18 }
  0x40   : > { %v238_v28 = vadd.f32 %v237_v25, %v219_v21 }
  0x42   : > { %v239_v31 = vadd.f32 %v238_v28, %v220_v24 }
  0x44   : > { %v240_v34 = vadd.f32 %v239_v31, %v221_v27 }
  0x46   : > { %v241_v37 = vadd.f32 %v240_v34, %v222_v30 }
  0x48   : > { %v242_v40 = vadd.f32 %v241_v37, %v223_v33 }
  0x4a   : > { %v243_v43 = vadd.f32 %v242_v40, %v224_v36 }
  0x4c   : > { %v244_v46 = vadd.f32 %v243_v43, %v225_v39 }
  0x4e   : > { %v245_v49 = vadd.f32 %v244_v46, %v226_v42 }
  0x50   : > { %v246_v52 = vadd.f32 %v245_v49, %v227_v45 }
  0x52   : > { %v247_v54 = vadd.f32 %v246_v52, %v228_v48 }
  0x54   : > { %v248_v55 = vadd.f32 %v247_v54, %v229_v51 }
  0x56   : > { %v249_v57 = vadd.f32 %v248_v55, %v230_v53 }
  0x58   : > { %v250_v58 = vadd.f32 %v249_v57, %v231_v56 }
  0x5a   : > { %251 = vst [vmem:[#allocation2] sm:$0xff] %v250_v58 }
  0x5b PF: > { %s354_s11 = sadd.s32 4294967295, %s489_s25 }
  0x5c   : > { %p356_p4 = scmp.ne.s32.totalorder %s354_s11, 0 }
  0x5e   : > { %256 = sbr.rel (%p356_p4) target bundleno = 370 (0x172), region = 36 }
  0x61   : > { %v257_v59 = vld [vmem:[#allocation2] sm:$0xff] (!%p356_p4) }
  0x62   : > { %258 = vadd.xlane.f32.xlu0 (!%p356_p4), %v257_v59 }
  0xef   : > { %v259_v60 = vpop.xlane.xlu0 %258 }
  0xf0   : > { %v260_v61 = vrot.slane %v259_v60, 4 }
  0xf2   : > { %v261_v62 = vadd.f32 %v260_v61, %v259_v60 }
  0xf4   : > { %v262_v63 = vrot.slane %v261_v62, 2 }
  0xf6   : > { %v263_v0 = vadd.f32 %v262_v63, %v261_v62 }
  0xf8   : > { %v264_v1 = vrot.slane %v263_v0, 1 }
  0xfa   : > { %v265_v2 = vadd.f32 %v264_v1, %v263_v0 }
  0xfc   : > { %359 = vpush %v265_v2 }
 0x12d   : > { %s360_s12 = spop %359 }
 0x12e   : > { %v267_v3 = vstv %s360_s12 }
 0x12f   : > { %390 = vrsqrt.f32 %v267_v3  ;;  %vm270_vm0 = vcmp.eq.f32.partialorder %v267_v3, inf  ;;  %v273_v6 = vand.u32 2147483648, %v267_v3  ;;  %vm272_vm1 = vcmp.eq.f32.partialorder %v267_v3, 0.0 }
 0x139   : > { %v391_v4 = vpop.eup %390 }
 0x13a   : > { %v269_v5 = vmul.f32 %v391_v4, %v267_v3 }
 0x13c   : > { %v271_v7 = vsel %vm270_vm0, %v267_v3, %v269_v5 }
 0x13d   : > { %v274_v8 = vsel %vm272_vm1, %v273_v6, %v271_v7 }
 0x13e   : > { %361 = vpush %v274_v8 }
 0x16f   : > { %s362_s13 = spop %361 }
 0x170   : > { %v276_v9 = vstv %s362_s13 }
 0x171   : > { %277 = vst [vmem:[%s494_s4] sm:$0xff] %v276_v9 }
 0x172 PF: > { %s23_s22 = sadd.s32 1, %s440_s22   ;;  %s536_s1 = smov %s436_s21 }
 0x173   : > { %p20_p5 = scmp.ge.s32.totalorder %s23_s22, 6   ;;  %s537_s21 = smov %s539_s23 }
 0x175   :  { %22 = sbr.rel (!%p20_p5) target bundleno = 27 (0x1b), region = 66 }

</bundles_post_ra>
